<compile_context>
chip_gen: v7x
topology: tpu7x:2x2x1
jax: 0.10.0
libtpu: 0.0.40
codegen_flags: <defaults>
</compile_context>

<pallas_src>
import functools

import jax
import jax.numpy as jnp
from jax.experimental import pallas as pl
from jax.experimental.pallas import tpu as pltpu


_PARALLEL = pltpu.CompilerParams(dimension_semantics=("parallel",))
_PAD_W0 = 8        # sublane-aligned left margin of the depthwise halo scratch
_ROW_TILE = 2048   # row tile for the flat 1x1-conv kernels (K1/K4)


def _row_tile(n, tile_m=_ROW_TILE):
    """Full-extent block if it fits, else a fixed multiple-of-8 tile (ragged tail is OK)."""
    return n if n <= tile_m else tile_m


# ----------------------------------------------------------------------------
# K1: fused cv0 + cv1 — ONE matmul with concatenated weights, lane-dense output
# ----------------------------------------------------------------------------

def _cv01_kernel(x_ref, w_ref, b_ref, y_ref):
    # act_dtype straight into the MXU; f32 accumulate + f32 epilogue.
    a = jnp.dot(x_ref[...], w_ref[...], preferred_element_type=jnp.float32) + b_ref[...]
    a = a * jax.nn.sigmoid(a)                     # SiLU
    y_ref[...] = a.astype(y_ref.dtype)


def cv01_fused(x2d, w01, b01, act_dtype):
    n, c1 = x2d.shape
    c2x = w01.shape[1]                            # = 2c
    tm = _row_tile(n)
    return pl.pallas_call(
        _cv01_kernel,
        out_shape=jax.ShapeDtypeStruct((n, c2x), act_dtype),
        grid=(pl.cdiv(n, tm),),
        in_specs=[pl.BlockSpec((tm, c1), lambda i: (i, 0)),
                  pl.BlockSpec((c1, c2x), lambda i: (0, 0)),
                  pl.BlockSpec((1, c2x), lambda i: (0, 0))],
        out_specs=pl.BlockSpec((tm, c2x), lambda i: (i, 0)),
        compiler_params=_PARALLEL,
    )(x2d, w01, b01)


# ----------------------------------------------------------------------------
# K2: MBConv stage 1 — 1x1 expand + SiLU + depthwise 3x3 + SiLU + fused SE gate
# ----------------------------------------------------------------------------

def _mbconv_stage1_kernel(prev_ref, pw1_w_ref, pw1_b_ref, dw_w_ref, dw_b_ref,
                          se_w_ref, se_b_ref, hdw_ref, gate_ref, hp_ref, *, H, W):
    midc = pw1_w_ref.shape[1]
    Wp = W + 2 * _PAD_W0

    # 1x1 expand conv + SiLU (per pixel, flattened matmul). LHS stays act_dtype for MXU.
    h = jnp.dot(prev_ref[...], pw1_w_ref[...],
                preferred_element_type=jnp.float32) + pw1_b_ref[...]
    h = h * jax.nn.sigmoid(h)

    # Zero only the halo border (interior is fully overwritten below). Done every grid
    # step: under "parallel" megacore sharding each core owns its own scratch copy.
    zrow = jnp.zeros((1, Wp, midc), jnp.float32)
    hp_ref[0:1, :, :] = zrow
    hp_ref[H + 1:H + 2, :, :] = zrow
    zcol = jnp.zeros((H, _PAD_W0, midc), jnp.float32)
    hp_ref[1:H + 1, 0:_PAD_W0, :] = zcol
    hp_ref[1:H + 1, _PAD_W0 + W:Wp, :] = zcol
    # Single bulk store of the expanded activation into the halo interior.
    hp_ref[1:H + 1, _PAD_W0:_PAD_W0 + W, :] = h.reshape(H, W, midc)

    # Depthwise 3x3 (stride 1) over the halo buffer, f32 accumulate.
    acc = jnp.zeros((H, W, midc), jnp.float32)
    for dh in range(3):
        for dw in range(3):
            col0 = _PAD_W0 - 1 + dw
            acc = acc + hp_ref[dh:dh + H, col0:col0 + W, :] * dw_w_ref[dh, dw, :]
    acc = acc + dw_b_ref[0]
    acc = acc * jax.nn.sigmoid(acc)               # SiLU

    acc2 = acc.reshape(H * W, midc)
    hdw_ref[...] = acc2.astype(hdw_ref.dtype)

    # EffectiveSE gate fused here: channel mean -> (1,midc)x(midc,midc) matmul -> hardsigmoid.
    mean = jnp.mean(acc2, axis=0, keepdims=True)
    g = jnp.dot(mean, se_w_ref[...], preferred_element_type=jnp.float32) + se_b_ref[...]
    gate_ref[0] = jnp.clip(g + 3.0, 0.0, 6.0) / 6.0


def mbconv_stage1(prev2d, B, H, W, pw1_w_in, pw1_b, dw_w, dw_b, se_w, se_b, act_dtype):
    cin, midc = pw1_w_in.shape
    hdw2d, gate = pl.pallas_call(
        functools.partial(_mbconv_stage1_kernel, H=H, W=W),
        out_shape=(jax.ShapeDtypeStruct((B * H * W, midc), act_dtype),
                   jax.ShapeDtypeStruct((B, 1, midc), jnp.float32)),
        grid=(B,),
        in_specs=[pl.BlockSpec((H * W, cin), lambda b: (b, 0)),
                  pl.BlockSpec((cin, midc), lambda b: (0, 0)),
                  pl.BlockSpec((1, midc), lambda b: (0, 0)),
                  pl.BlockSpec((3, 3, midc), lambda b: (0, 0, 0)),
                  pl.BlockSpec((1, midc), lambda b: (0, 0)),
                  pl.BlockSpec((midc, midc), lambda b: (0, 0)),
                  pl.BlockSpec((1, midc), lambda b: (0, 0))],
        out_specs=(pl.BlockSpec((H * W, midc), lambda b: (b, 0)),
                   pl.BlockSpec((1, 1, midc), lambda b: (b, 0, 0))),
        scratch_shapes=[pltpu.VMEM((H + 2, W + 2 * _PAD_W0, midc), jnp.float32)],
        compiler_params=_PARALLEL,
    )(prev2d, pw1_w_in, pw1_b, dw_w, dw_b, se_w, se_b)
    return hdw2d, gate


# ----------------------------------------------------------------------------
# K3: MBConv stage 2 — SE gate folded into the projection weight + optional residual
# ----------------------------------------------------------------------------

def _mbconv_proj_kernel(hdw_ref, gate_ref, w_ref, b_ref, *rest, add):
    if add:
        prev_ref, o_ref = rest
    else:
        (o_ref,) = rest
    # gate_ref block is (1, midc, 1) -> gate column (midc, 1), scales the K-dim of w.
    w_scaled = (w_ref[...].astype(jnp.float32) * gate_ref[0]).astype(w_ref.dtype)
    y = jnp.dot(hdw_ref[...], w_scaled, preferred_element_type=jnp.float32) + b_ref[...]
    if add:
        y = y + prev_ref[...].astype(jnp.float32)
    o_ref[...] = y.astype(o_ref.dtype)


def mbconv_proj(hdw2d, gate_col, w, b, prev2d, B, H, W, act_dtype):
    midc, c = w.shape
    add = prev2d is not None
    in_specs = [pl.BlockSpec((H * W, midc), lambda bi: (bi, 0)),
                pl.BlockSpec((1, midc, 1), lambda bi: (bi, 0, 0)),
                pl.BlockSpec((midc, c), lambda bi: (0, 0)),
                pl.BlockSpec((1, c), lambda bi: (0, 0))]
    args = [hdw2d, gate_col, w, b]
    if add:
        in_specs.append(pl.BlockSpec((H * W, c), lambda bi: (bi, 0)))
        args.append(prev2d)
    return pl.pallas_call(
        functools.partial(_mbconv_proj_kernel, add=add),
        out_shape=jax.ShapeDtypeStruct((B * H * W, c), act_dtype),
        grid=(B,),
        in_specs=in_specs,
        out_specs=pl.BlockSpec((H * W, c), lambda bi: (bi, 0)),
        compiler_params=_PARALLEL,
    )(*args)


# ----------------------------------------------------------------------------
# K4: cv2 on the *virtual* concat — per-chunk matmuls accumulated in-kernel
# ----------------------------------------------------------------------------

def _cv2_kernel(*refs, n_chunks):
    xs = refs[:n_chunks]
    ws = refs[n_chunks:2 * n_chunks]
    b_ref = refs[2 * n_chunks]
    o_ref = refs[2 * n_chunks + 1]
    acc = None
    for x_ref, w_ref in zip(xs, ws):
        t = jnp.dot(x_ref[...], w_ref[...], preferred_element_type=jnp.float32)
        acc = t if acc is None else acc + t
    acc = acc + b_ref[...]
    acc = acc * jax.nn.sigmoid(acc)               # SiLU
    o_ref[...] = acc.astype(o_ref.dtype)


def cv2_fused(chunks2d, w_chunks, b, out_dtype):
    n = chunks2d[0].shape[0]
    c2 = w_chunks[0].shape[1]
    tm = _row_tile(n)
    in_specs = ([pl.BlockSpec((tm, ch.shape[1]), lambda i: (i, 0)) for ch in chunks2d]
                + [pl.BlockSpec(w.shape, lambda i: (0, 0)) for w in w_chunks]
                + [pl.BlockSpec((1, c2), lambda i: (0, 0))])
    return pl.pallas_call(
        functools.partial(_cv2_kernel, n_chunks=len(chunks2d)),
        out_shape=jax.ShapeDtypeStruct((n, c2), out_dtype),
        grid=(pl.cdiv(n, tm),),
        in_specs=in_specs,
        out_specs=pl.BlockSpec((tm, c2), lambda i: (i, 0)),
        compiler_params=_PARALLEL,
    )(*chunks2d, *w_chunks, b)


# ----------------------------------------------------------------------------
# Parameter construction (deterministic, BN folded into conv weights)
# ----------------------------------------------------------------------------

_BN_EPS = 1e-3  # ultralytics Conv: BatchNorm2d(eps=0.001)


def _bn_fold(key, cout):
    k1, k2, k3, k4 = jax.random.split(key, 4)
    gamma = jax.random.uniform(k1, (cout,), jnp.float32, 0.5, 1.5)
    beta = 0.1 * jax.random.normal(k2, (cout,), jnp.float32)
    mean = 0.1 * jax.random.normal(k3, (cout,), jnp.float32)
    var = jax.random.uniform(k4, (cout,), jnp.float32, 0.5, 1.5)
    scale = gamma / jnp.sqrt(var + _BN_EPS)
    bias = beta - mean * scale
    return scale, bias


def _conv1x1_bn(key, cin, cout):
    kw, kb = jax.random.split(key)
    w = 0.1 * jax.random.normal(kw, (cout, cin), jnp.float32)   # torch (Cout, Cin, 1, 1)
    scale, bias = _bn_fold(kb, cout)
    w_folded = (w * scale[:, None]).T                           # -> (Cin, Cout)
    return w_folded, bias.reshape(1, cout)


def _dwconv3x3_bn(key, c):
    kw, kb = jax.random.split(key)
    w = 0.1 * jax.random.normal(kw, (c, 3, 3), jnp.float32)     # torch (C, 1, 3, 3)
    scale, bias = _bn_fold(kb, c)
    w_folded = jnp.transpose(w * scale[:, None, None], (1, 2, 0))   # -> (3, 3, C)
    return w_folded, bias.reshape(1, c)


def init_params(key, c1, c2, n=1, shortcut=False, e=0.5):
    c = int(c2 * e)
    keys = jax.random.split(key, 3 + n)
    cv0_w, cv0_b = _conv1x1_bn(keys[0], c1, c)
    cv1_w, cv1_b = _conv1x1_bn(keys[1], c1, c)
    cv2_w, cv2_b = _conv1x1_bn(keys[2], (2 + n) * c, c2)
    mb = []
    for i in range(n):
        k = jax.random.split(keys[3 + i], 4)
        midc = c * 4                                            # MBConv expansion e=4
        pw1_w, pw1_b = _conv1x1_bn(k[0], c, midc)
        dw_w, dw_b = _dwconv3x3_bn(k[1], midc)
        kse_w, kse_b = jax.random.split(k[2])
        se_w = (0.1 * jax.random.normal(kse_w, (midc, midc), jnp.float32)).T  # (Cin, Cout)
        se_b = 0.1 * jax.random.normal(kse_b, (1, midc), jnp.float32)
        proj_w, proj_b = _conv1x1_bn(k[3], midc, c)             # act=False conv
        mb.append(dict(pw1_w=pw1_w, pw1_b=pw1_b, dw_w=dw_w, dw_b=dw_b,
                       se_w=se_w, se_b=se_b, proj_w=proj_w, proj_b=proj_b,
                       add=bool(shortcut)))                     # inc == ouc always here
    return dict(c=c, c2=c2, cv0_w=cv0_w, cv0_b=cv0_b, cv1_w=cv1_w, cv1_b=cv1_b,
                cv2_w=cv2_w, cv2_b=cv2_b, mbconv=mb)


# ----------------------------------------------------------------------------
# Forward pass (Pallas) and pure-JAX reference
# ----------------------------------------------------------------------------

def c2f_embc_v2_forward(x_nchw, params, act_dtype=jnp.bfloat16, out_dtype=jnp.float32):
    B, C1, H, W = x_nchw.shape
    c, c2 = params['c'], params['c2']
    x = jnp.transpose(x_nchw, (0, 2, 3, 1)).astype(act_dtype)   # NCHW -> NHWC
    x2d = x.reshape(B * H * W, C1)

    # K1: cv0 + cv1 as a single lane-dense (c1, 2c) matmul.
    w01 = jnp.concatenate([params['cv0_w'], params['cv1_w']], axis=1).astype(act_dtype)
    b01 = jnp.concatenate([params['cv0_b'], params['cv1_b']], axis=1)
    y01 = cv01_fused(x2d, w01, b01, act_dtype)                  # (n_pix, 2c)

    chunks = [y01]
    prev, prev_off = y01, c          # first MBConv consumes channels [c:2c) of y01
    for blk in params['mbconv']:
        midc = blk['pw1_w'].shape[1]
        if prev_off:
            # Fold the channel offset into the expand weight (zero rows): no lane slicing
            # of the fused cv0/cv1 output is ever needed inside the kernel.
            pw1_in = jnp.concatenate(
                [jnp.zeros((prev_off, midc), jnp.float32), blk['pw1_w']], axis=0)
        else:
            pw1_in = blk['pw1_w']
        hdw, gate = mbconv_stage1(prev, B, H, W, pw1_in.astype(act_dtype), blk['pw1_b'],
                                  blk['dw_w'], blk['dw_b'], blk['se_w'], blk['se_b'],
                                  act_dtype)
        gate_col = gate.reshape(B, midc, 1)      # metadata-only reshape (size-1 dims)
        if blk['add']:
            resid = prev[:, prev_off:prev_off + c] if prev_off else prev
        else:
            resid = None
        out = mbconv_proj(hdw, gate_col, blk['proj_w'].astype(act_dtype), blk['proj_b'],
                          resid, B, H, W, act_dtype)
        # Dropout2d is identity in eval mode.
        chunks.append(out)
        prev, prev_off = out, 0

    # K4: cv2 on the virtual concat — per-branch weight slices accumulated in one kernel.
    w_chunks, off = [], 0
    for ch in chunks:
        w_chunks.append(params['cv2_w'][off:off + ch.shape[1], :].astype(act_dtype))
        off += ch.shape[1]
    out2d = cv2_fused(chunks, w_chunks, params['cv2_b'], out_dtype)
    out = out2d.reshape(B, H, W, c2)
    return jnp.transpose(out, (0, 3, 1, 2))                     # NHWC -> NCHW


def _ref_pw(x, w, b, act):
    y = jnp.einsum('bhwc,cd->bhwd', x, w) + b.reshape(1, 1, 1, -1)
    return y * jax.nn.sigmoid(y) if act else y


def ref_forward(x_nchw, params):
    B, C1, H, W = x_nchw.shape
    x = jnp.transpose(x_nchw, (0, 2, 3, 1))
    y0 = _ref_pw(x, params['cv0_w'], params['cv0_b'], True)
    y1 = _ref_pw(x, params['cv1_w'], params['cv1_b'], True)
    ys = [y0, y1]
    prev = y1
    for blk in params['mbconv']:
        h = _ref_pw(prev, blk['pw1_w'], blk['pw1_b'], True)
        hp = jnp.pad(h, ((0, 0), (1, 1), (1, 1), (0, 0)))
        acc = jnp.zeros_like(h)
        for dh in range(3):
            for dw in range(3):
                acc = acc + hp[:, dh:dh + H, dw:dw + W, :] * blk['dw_w'][dh, dw, :]
        acc = acc + blk['dw_b'][0]
        hdw = acc * jax.nn.sigmoid(acc)
        se = jnp.mean(hdw, axis=(1, 2), keepdims=True)
        gate = jnp.einsum('bxyc,cd->bxyd', se, blk['se_w']) + blk['se_b'].reshape(1, 1, 1, -1)
        gate = jnp.clip(gate + 3.0, 0.0, 6.0) / 6.0
        hse = hdw * gate
        hpr = _ref_pw(hse, blk['proj_w'], blk['proj_b'], False)
        if blk['add']:
            hpr = prev + hpr
        ys.append(hpr)
        prev = hpr
    ycat = jnp.concatenate(ys, axis=-1)
    out = _ref_pw(ycat, params['cv2_w'], params['cv2_b'], True)
    return jnp.transpose(out, (0, 3, 1, 2))


# ----------------------------------------------------------------------------

if __name__ == "__main__":
    key = jax.random.PRNGKey(0)
    kx, kp = jax.random.split(key)

    B, C1, H, W = 2, 4, 16, 16
    C2 = 8
    x = jax.random.normal(kx, (B, C1, H, W), jnp.float32)

    # Config 1: n=1, no shortcut (module defaults) — f32 activation carry, tight check.
    p1 = init_params(kp, C1, C2, n=1, shortcut=False, e=0.5)
    out_f32 = jax.block_until_ready(c2f_embc_v2_forward(x, p1, act_dtype=jnp.float32))
    ref1 = jax.block_until_ready(ref_forward(x, p1))
    assert out_f32.shape == (B, C2, H, W), out_f32.shape
    assert jnp.allclose(out_f32, ref1, rtol=2e-3, atol=2e-3), \
        float(jnp.max(jnp.abs(out_f32 - ref1)))

    # Same config with bf16 activation/weight carry (f32 accumulate/epilogue in-kernel).
    out_bf16 = jax.block_until_ready(c2f_embc_v2_forward(x, p1, act_dtype=jnp.bfloat16))
    assert jnp.allclose(out_bf16, ref1, rtol=5e-2, atol=5e-2), \
        float(jnp.max(jnp.abs(out_bf16 - ref1)))

    # Config 2: n=2 with residual shortcuts — exercises the residual path.
    p2 = init_params(jax.random.fold_in(kp, 1), C1, C2, n=2, shortcut=True, e=0.5)
    out2 = jax.block_until_ready(c2f_embc_v2_forward(x, p2, act_dtype=jnp.float32))
    ref2 = jax.block_until_ready(ref_forward(x, p2))
    assert jnp.allclose(out2, ref2, rtol=2e-3, atol=2e-3), \
        float(jnp.max(jnp.abs(out2 - ref2)))

    print("KERNEL_OK")
</pallas_src>

<mosaic_0001>
module attributes {stable_mosaic.version = 11 : i64} {
  func.func @_cv01_kernel(%arg0: i32, %arg1: memref<512x4xf32, #tpu.memory_space<vmem>>, %arg2: memref<4x8xf32, #tpu.memory_space<vmem>>, %arg3: memref<1x8xf32, #tpu.memory_space<vmem>>, %arg4: memref<512x8xf32, #tpu.memory_space<vmem>>) attributes {dimension_semantics = [#tpu.dimension_semantics<parallel>], iteration_bounds = array<i64: 1>, scalar_prefetch = 0 : i64, scratch_operands = 0 : i64, tpu.core_type = #tpu.core_type<tc>, window_params = [{transform_indices = @transform_0, window_bounds = array<i64: 512, 4>}, {pipeline_mode = #tpu.pipeline_mode<synchronous>, transform_indices = @transform_1, window_bounds = array<i64: 4, 8>}, {pipeline_mode = #tpu.pipeline_mode<synchronous>, transform_indices = @transform_2, window_bounds = array<i64: 1, 8>}, {transform_indices = @transform_3, window_bounds = array<i64: 512, 8>}]} {
    %c0 = arith.constant 0 : index
    %c0_0 = arith.constant 0 : index
    %0 = vector.load %arg1[%c0, %c0_0] : memref<512x4xf32, #tpu.memory_space<vmem>>, vector<512x4xf32>
    %c0_1 = arith.constant 0 : index
    %c0_2 = arith.constant 0 : index
    %1 = vector.load %arg2[%c0_1, %c0_2] : memref<4x8xf32, #tpu.memory_space<vmem>>, vector<4x8xf32>
    %cst = arith.constant dense<0.000000e+00> : vector<512x8xf32>
    %2 = tpu.matmul %0, %1, %cst {dimension_numbers = #tpu.dot_dimension_numbers<[1], [0], [0], [1], [0, 0, 1, 1], [], []>} : vector<512x4xf32>, vector<4x8xf32>, vector<512x8xf32> -> vector<512x8xf32>
    %c0_3 = arith.constant 0 : index
    %c0_4 = arith.constant 0 : index
    %3 = vector.load %arg3[%c0_3, %c0_4] : memref<1x8xf32, #tpu.memory_space<vmem>>, vector<1x8xf32>
    %4 = vector.broadcast %3 : vector<1x8xf32> to vector<512x8xf32>
    %5 = arith.addf %2, %4 : vector<512x8xf32>
    %6 = arith.negf %5 : vector<512x8xf32>
    %7 = math.exp %6 : vector<512x8xf32>
    %cst_5 = arith.constant 1.000000e+00 : f32
    %8 = vector.broadcast %cst_5 : f32 to vector<512x8xf32>
    %9 = arith.addf %8, %7 : vector<512x8xf32>
    %10 = arith.divf %8, %9 : vector<512x8xf32>
    %11 = arith.mulf %5, %10 : vector<512x8xf32>
    %c0_6 = arith.constant 0 : index
    %c0_7 = arith.constant 0 : index
    %12 = vector.load %arg4[%c0_6, %c0_7] : memref<512x8xf32, #tpu.memory_space<vmem>>, vector<512x8xf32>
    tpu.vector_store %arg4[%c0_6, %c0_7], %11 {strides = array<i32>} : memref<512x8xf32, #tpu.memory_space<vmem>>, vector<512x8xf32>,
    return
  }
  func.func @transform_0(%arg0: i32) -> (i32, i32) {
    %c0_i32 = arith.constant 0 : i32
    %c0_i32_0 = arith.constant 0 : i32
    return %arg0, %c0_i32 : i32, i32
  }
  func.func @transform_1(%arg0: i32) -> (i32, i32) {
    %c0_i32 = arith.constant 0 : i32
    %c0_i32_0 = arith.constant 0 : i32
    %c0_i32_1 = arith.constant 0 : i32
    return %c0_i32, %c0_i32_0 : i32, i32
  }
  func.func @transform_2(%arg0: i32) -> (i32, i32) {
    %c0_i32 = arith.constant 0 : i32
    %c0_i32_0 = arith.constant 0 : i32
    %c0_i32_1 = arith.constant 0 : i32
    return %c0_i32, %c0_i32_0 : i32, i32
  }
  func.func @transform_3(%arg0: i32) -> (i32, i32) {
    %c0_i32 = arith.constant 0 : i32
    %c0_i32_0 = arith.constant 0 : i32
    return %arg0, %c0_i32 : i32, i32
  }
}

</mosaic_0001>

<bundles_post_ra>
// kernel: tpu_custom_call.1
= control target key start
LH: loop header
LB: loop body
LE: loop exit
PB: predicated region body
PF: predicated region fallthrough
CT: control target
= control target key end

     0   :  { %vm279_vm0 = vcmask 1043456   ;;  %vm86_vm1 = vcmask 31744   ;;  %vm1116_vm2 = vcmask 64512   ;;  %s2659_s1 = inlined_call_operand.vmem [shape: f32[4,8], index: 1, kind: input, shape index: {}]   ;;  %s2660_s0 = inlined_call_operand.vmem [shape: f32[512,4], index: 0, kind: input, shape index: {}]   ;;  %s2661_s2 = inlined_call_operand.vmem [shape: f32[1,8], index: 2, kind: input, shape index: {}]   ;;  %s2662_s3 = inlined_call_operand.vmem [shape: f32[512,8], index: 3, kind: output, shape index: {}]  }
   0x1   :  { %v78_v0 = vld [vmem:[%s2659_s1] sm:$0xf]  ;;  %v15_v3 = vld [vmem:[%s2660_s0 + $0x8] sm:$0xff]  ;;  %v16_v5 = vld [vmem:[%s2660_s0 + $0x10] sm:$0xff] }
   0x2   :  { %v14_v1 = vld [vmem:[%s2660_s0] sm:$0xff]  ;;  %1380 = vmatprep.subr.msk.mxu0 %vm279_vm0, %v78_v0  ;;  %1478 = vmatprep.subr.msk.mxu1 %vm279_vm0, %v78_v0  ;;  %v47_v4 = vld [vmem:[%s2660_s0 + $0x108] sm:$0xff]  ;;  %v48_v6 = vld [vmem:[%s2660_s0 + $0x110] sm:$0xff] }
   0x3   :  { %v46_v2 = vld [vmem:[%s2660_s0 + $0x100] sm:$0xff]  ;;  %1381 = vmatpush3.msk.msra.mxu0 %vm279_vm0, %v78_v0  ;;  %1479 = vmatpush3.msk.msra.mxu1 %vm279_vm0, %v78_v0  ;;  %v17_v7 = vld [vmem:[%s2660_s0 + $0x18] sm:$0xff]  ;;  %v19_v11 = vld [vmem:[%s2660_s0 + $0x28] sm:$0xff] }
   0x4   :  { %1382 = vmatprep.mubr.msk.f32.mxu0 %vm86_vm1, %v14_v1  ;;  %1430 = vmatprep.mubr.msk.f32.mxu1 %vm86_vm1, %v46_v2  ;;  %v49_v8 = vld [vmem:[%s2660_s0 + $0x118] sm:$0xff]  ;;  %v18_v9 = vld [vmem:[%s2660_s0 + $0x20] sm:$0xff]  ;;  %v51_v12 = vld [vmem:[%s2660_s0 + $0x128] sm:$0xff] }
   0x5   :  { %1383 = vmatmul.mubr.msk.f32.vlgmr.msra.gmra.mrb[0].mxu0 %vm86_vm1, %v15_v3  ;;  %1431 = vmatmul.mubr.msk.f32.vlgmr.msra.gmra.mrb[0].mxu1 %vm86_vm1, %v47_v4  ;;  %v50_v10 = vld [vmem:[%s2660_s0 + $0x120] sm:$0xff]  ;;  %v20_v13 = vld [vmem:[%s2660_s0 + $0x30] sm:$0xff]  ;;  %v21_v15 = vld [vmem:[%s2660_s0 + $0x38] sm:$0xff] }
   0x6   :  { %1385 = vmatprep.mubr.msk.f32.mxu0 %vm86_vm1, %v16_v5  ;;  %1433 = vmatprep.mubr.msk.f32.mxu1 %vm86_vm1, %v48_v6  ;;  %v52_v14 = vld [vmem:[%s2660_s0 + $0x130] sm:$0xff]  ;;  %v53_v16 = vld [vmem:[%s2660_s0 + $0x138] sm:$0xff]  ;;  %v22_v17 = vld [vmem:[%s2660_s0 + $0x40] sm:$0xff] }
   0x7   :  { %v54_v18 = vld [vmem:[%s2660_s0 + $0x140] sm:$0xff]  ;;  %v23_v19 = vld [vmem:[%s2660_s0 + $0x48] sm:$0xff]  ;;  %v24_v21 = vld [vmem:[%s2660_s0 + $0x50] sm:$0xff] }
   0x8   :  { %v55_v20 = vld [vmem:[%s2660_s0 + $0x148] sm:$0xff]  ;;  %v56_v22 = vld [vmem:[%s2660_s0 + $0x150] sm:$0xff]  ;;  %v25_v23 = vld [vmem:[%s2660_s0 + $0x58] sm:$0xff] }
   0x9   :  { %1386 = vmatmul.mubr.msk.f32.gmra.mrb[2].mxu0 %vm86_vm1, %v17_v7  ;;  %1434 = vmatmul.mubr.msk.f32.gmra.mrb[2].mxu1 %vm86_vm1, %v49_v8  ;;  %v57_v24 = vld [vmem:[%s2660_s0 + $0x158] sm:$0xff]  ;;  %v26_v25 = vld [vmem:[%s2660_s0 + $0x60] sm:$0xff]  ;;  %v27_v27 = vld [vmem:[%s2660_s0 + $0x68] sm:$0xff] }
   0xa   :  { %1388 = vmatprep.mubr.msk.f32.mxu0 %vm86_vm1, %v18_v9  ;;  %1436 = vmatprep.mubr.msk.f32.mxu1 %vm86_vm1, %v50_v10  ;;  %v58_v26 = vld [vmem:[%s2660_s0 + $0x160] sm:$0xff]  ;;  %v59_v28 = vld [vmem:[%s2660_s0 + $0x168] sm:$0xff]  ;;  %v28_v29 = vld [vmem:[%s2660_s0 + $0x70] sm:$0xff] }
   0xb   :  { %v60_v30 = vld [vmem:[%s2660_s0 + $0x170] sm:$0xff]  ;;  %v29_v31 = vld [vmem:[%s2660_s0 + $0x78] sm:$0xff]  ;;  %v30_v33 = vld [vmem:[%s2660_s0 + $0x80] sm:$0xff] }
   0xc   :  { %v61_v32 = vld [vmem:[%s2660_s0 + $0x178] sm:$0xff]  ;;  %v62_v34 = vld [vmem:[%s2660_s0 + $0x180] sm:$0xff]  ;;  %v31_v35 = vld [vmem:[%s2660_s0 + $0x88] sm:$0xff] }
   0xd   :  { %1389 = vmatmul.mubr.msk.f32.gmra.mrb[4].mxu0 %vm86_vm1, %v19_v11  ;;  %1437 = vmatmul.mubr.msk.f32.gmra.mrb[4].mxu1 %vm86_vm1, %v51_v12  ;;  %v63_v36 = vld [vmem:[%s2660_s0 + $0x188] sm:$0xff]  ;;  %v32_v37 = vld [vmem:[%s2660_s0 + $0x90] sm:$0xff]  ;;  %v33_v39 = vld [vmem:[%s2660_s0 + $0x98] sm:$0xff] }
   0xe   :  { %1391 = vmatprep.mubr.msk.f32.mxu0 %vm86_vm1, %v20_v13  ;;  %1439 = vmatprep.mubr.msk.f32.mxu1 %vm86_vm1, %v52_v14  ;;  %v64_v38 = vld [vmem:[%s2660_s0 + $0x190] sm:$0xff]  ;;  %v65_v40 = vld [vmem:[%s2660_s0 + $0x198] sm:$0xff]  ;;  %v34_v41 = vld [vmem:[%s2660_s0 + $0xa0] sm:$0xff] }
   0xf   :  { %v66_v42 = vld [vmem:[%s2660_s0 + $0x1a0] sm:$0xff]  ;;  %v35_v43 = vld [vmem:[%s2660_s0 + $0xa8] sm:$0xff]  ;;  %v36_v45 = vld [vmem:[%s2660_s0 + $0xb0] sm:$0xff] }
  0x10   :  { %v67_v44 = vld [vmem:[%s2660_s0 + $0x1a8] sm:$0xff]  ;;  %v68_v46 = vld [vmem:[%s2660_s0 + $0x1b0] sm:$0xff]  ;;  %v37_v47 = vld [vmem:[%s2660_s0 + $0xb8] sm:$0xff] }
  0x11   :  { %1392 = vmatmul.mubr.msk.f32.gmra.mrb[6].mxu0 %vm86_vm1, %v21_v15  ;;  %1440 = vmatmul.mubr.msk.f32.gmra.mrb[6].mxu1 %vm86_vm1, %v53_v16  ;;  %v69_v48 = vld [vmem:[%s2660_s0 + $0x1b8] sm:$0xff]  ;;  %v38_v49 = vld [vmem:[%s2660_s0 + $0xc0] sm:$0xff]  ;;  %v39_v51 = vld [vmem:[%s2660_s0 + $0xc8] sm:$0xff] }
  0x12   :  { %1394 = vmatprep.mubr.msk.f32.mxu0 %vm86_vm1, %v22_v17  ;;  %1442 = vmatprep.mubr.msk.f32.mxu1 %vm86_vm1, %v54_v18  ;;  %v70_v50 = vld [vmem:[%s2660_s0 + $0x1c0] sm:$0xff]  ;;  %v71_v52 = vld [vmem:[%s2660_s0 + $0x1c8] sm:$0xff]  ;;  %v40_v53 = vld [vmem:[%s2660_s0 + $0xd0] sm:$0xff] }
  0x13   :  { %v72_v54 = vld [vmem:[%s2660_s0 + $0x1d0] sm:$0xff]  ;;  %v41_v55 = vld [vmem:[%s2660_s0 + $0xd8] sm:$0xff]  ;;  %v42_v57 = vld [vmem:[%s2660_s0 + $0xe0] sm:$0xff] }
  0x14   :  { %v73_v56 = vld [vmem:[%s2660_s0 + $0x1d8] sm:$0xff]  ;;  %v74_v58 = vld [vmem:[%s2660_s0 + $0x1e0] sm:$0xff]  ;;  %v43_v59 = vld [vmem:[%s2660_s0 + $0xe8] sm:$0xff] }
  0x15   :  { %1395 = vmatmul.mubr.msk.f32.gmra.mrb[8].mxu0 %vm86_vm1, %v23_v19  ;;  %1443 = vmatmul.mubr.msk.f32.gmra.mrb[8].mxu1 %vm86_vm1, %v55_v20  ;;  %v75_v60 = vld [vmem:[%s2660_s0 + $0x1e8] sm:$0xff]  ;;  %v44_v61 = vld [vmem:[%s2660_s0 + $0xf0] sm:$0xff]  ;;  %v45_v63 = vld [vmem:[%s2660_s0 + $0xf8] sm:$0xff] }
  0x16   :  { %1397 = vmatprep.mubr.msk.f32.mxu0 %vm86_vm1, %v24_v21  ;;  %1445 = vmatprep.mubr.msk.f32.mxu1 %vm86_vm1, %v56_v22  ;;  %v76_v62 = vld [vmem:[%s2660_s0 + $0x1f0] sm:$0xff]  ;;  %v77_v0 = vld [vmem:[%s2660_s0 + $0x1f8] sm:$0xff]  ;;  %v2018_v1 = vld [vmem:[%s2661_s2] ss:$0 sm:$0xff] }
  0x19   :  { %1398 = vmatmul.mubr.msk.f32.gmra.mrb[10].mxu0 %vm86_vm1, %v25_v23  ;;  %1446 = vmatmul.mubr.msk.f32.gmra.mrb[10].mxu1 %vm86_vm1, %v57_v24 }
  0x1a   :  { %1400 = vmatprep.mubr.msk.f32.mxu0 %vm86_vm1, %v26_v25  ;;  %1448 = vmatprep.mubr.msk.f32.mxu1 %vm86_vm1, %v58_v26 }
  0x1d   :  { %1401 = vmatmul.mubr.msk.f32.gmra.mrb[12].mxu0 %vm86_vm1, %v27_v27  ;;  %1449 = vmatmul.mubr.msk.f32.gmra.mrb[12].mxu1 %vm86_vm1, %v59_v28 }
  0x1e   :  { %1403 = vmatprep.mubr.msk.f32.mxu0 %vm86_vm1, %v28_v29  ;;  %1451 = vmatprep.mubr.msk.f32.mxu1 %vm86_vm1, %v60_v30 }
  0x21   :  { %1404 = vmatmul.mubr.msk.f32.gmra.mrb[14].mxu0 %vm86_vm1, %v29_v31  ;;  %1452 = vmatmul.mubr.msk.f32.gmra.mrb[14].mxu1 %vm86_vm1, %v61_v32 }
  0x22   :  { %1406 = vmatprep.mubr.msk.f32.mxu0 %vm86_vm1, %v30_v33  ;;  %1454 = vmatprep.mubr.msk.f32.mxu1 %vm86_vm1, %v62_v34 }
  0x25   :  { %1407 = vmatmul.mubr.msk.f32.gmra.mrb[16].mxu0 %vm86_vm1, %v31_v35  ;;  %1455 = vmatmul.mubr.msk.f32.gmra.mrb[16].mxu1 %vm86_vm1, %v63_v36 }
  0x26   :  { %1409 = vmatprep.mubr.msk.f32.mxu0 %vm86_vm1, %v32_v37  ;;  %1457 = vmatprep.mubr.msk.f32.mxu1 %vm86_vm1, %v64_v38 }
  0x29   :  { %1410 = vmatmul.mubr.msk.f32.gmra.mrb[18].mxu0 %vm86_vm1, %v33_v39  ;;  %1458 = vmatmul.mubr.msk.f32.gmra.mrb[18].mxu1 %vm86_vm1, %v65_v40 }
  0x2a   :  { %1412 = vmatprep.mubr.msk.f32.mxu0 %vm86_vm1, %v34_v41  ;;  %1460 = vmatprep.mubr.msk.f32.mxu1 %vm86_vm1, %v66_v42 }
  0x2d   :  { %1413 = vmatmul.mubr.msk.f32.gmra.mrb[20].mxu0 %vm86_vm1, %v35_v43  ;;  %1461 = vmatmul.mubr.msk.f32.gmra.mrb[20].mxu1 %vm86_vm1, %v67_v44 }
  0x2e   :  { %1415 = vmatprep.mubr.msk.f32.mxu0 %vm86_vm1, %v36_v45  ;;  %1463 = vmatprep.mubr.msk.f32.mxu1 %vm86_vm1, %v68_v46 }
  0x31   :  { %1416 = vmatmul.mubr.msk.f32.gmra.mrb[22].mxu0 %vm86_vm1, %v37_v47  ;;  %1464 = vmatmul.mubr.msk.f32.gmra.mrb[22].mxu1 %vm86_vm1, %v69_v48 }
  0x32   :  { %1418 = vmatprep.mubr.msk.f32.mxu0 %vm86_vm1, %v38_v49  ;;  %1466 = vmatprep.mubr.msk.f32.mxu1 %vm86_vm1, %v70_v50 }
  0x35   :  { %1419 = vmatmul.mubr.msk.f32.gmra.mrb[24].mxu0 %vm86_vm1, %v39_v51  ;;  %1467 = vmatmul.mubr.msk.f32.gmra.mrb[24].mxu1 %vm86_vm1, %v71_v52 }
  0x36   :  { %1421 = vmatprep.mubr.msk.f32.mxu0 %vm86_vm1, %v40_v53  ;;  %1469 = vmatprep.mubr.msk.f32.mxu1 %vm86_vm1, %v72_v54 }
  0x39   :  { %1422 = vmatmul.mubr.msk.f32.gmra.mrb[26].mxu0 %vm86_vm1, %v41_v55  ;;  %1470 = vmatmul.mubr.msk.f32.gmra.mrb[26].mxu1 %vm86_vm1, %v73_v56 }
  0x3a   :  { %1424 = vmatprep.mubr.msk.f32.mxu0 %vm86_vm1, %v42_v57  ;;  %1472 = vmatprep.mubr.msk.f32.mxu1 %vm86_vm1, %v74_v58 }
  0x3d   :  { %1425 = vmatmul.mubr.msk.f32.gmra.mrb[28].mxu0 %vm86_vm1, %v43_v59  ;;  %1473 = vmatmul.mubr.msk.f32.gmra.mrb[28].mxu1 %vm86_vm1, %v75_v60 }
  0x3e   :  { %1427 = vmatprep.mubr.msk.f32.mxu0 %vm86_vm1, %v44_v61  ;;  %1475 = vmatprep.mubr.msk.f32.mxu1 %vm86_vm1, %v76_v62 }
  0x41   :  { %1428 = vmatmul.mubr.msk.f32.gmra.mrb[30].mxu0 %vm86_vm1, %v45_v63  ;;  %1476 = vmatmul.mubr.msk.f32.gmra.mrb[30].mxu1 %vm86_vm1, %v77_v0 }
  0xd8   :  { %v1384_v2 = vpop.f32.mrb[0].mxu0  ;;  %v1432_v3 = vpop.f32.mrb[0].mxu1 }
  0xd9   :  { %v2021_v4 = vadd.f32 %v1384_v2, %v2018_v1  ;;  %v2024_v5 = vadd.f32 %v1432_v3, %v2018_v1  ;;  %v349_v6 = vpop.f32.mrb[1].mxu0  ;;  %v509_v7 = vpop.f32.mrb[1].mxu1 }
  0xda   :  { %v2027_v8 = vadd.f32 %v2018_v1, %v349_v6  ;;  %v2030_v9 = vadd.f32 %v2018_v1, %v509_v7 }
  0xdb   :  { %v1252_v10 = vmul.f32 -1.442695, %v2021_v4  ;;  %v1284_v11 = vmul.f32 -1.442695, %v2024_v5 }
  0xdc   :  { %v1251_v12 = vmul.f32 -1.442695, %v2027_v8  ;;  %v1283_v13 = vmul.f32 -1.442695, %v2030_v9  ;;  %v1387_v14 = vpop.f32.mrb[2].mxu0  ;;  %v1435_v15 = vpop.f32.mrb[2].mxu1 }
  0xdd   :  { %1480 = vpow2.f32 %v1252_v10  ;;  %v2037_v16 = vadd.f32 %v1387_v14, %v2018_v1  ;;  %v2040_v17 = vadd.f32 %v1435_v15, %v2018_v1  ;;  %v359_v18 = vpop.f32.mrb[3].mxu0  ;;  %v519_v19 = vpop.f32.mrb[3].mxu1 }
  0xde   :  { %1482 = vpow2.f32 %v1284_v11  ;;  %v2043_v20 = vadd.f32 %v2018_v1, %v359_v18  ;;  %v2046_v21 = vadd.f32 %v2018_v1, %v519_v19 }
  0xdf   :  { %1484 = vpow2.f32 %v1251_v12  ;;  %v1254_v22 = vmul.f32 -1.442695, %v2037_v16  ;;  %v1286_v23 = vmul.f32 -1.442695, %v2040_v17 }
  0xe0   :  { %1486 = vpow2.f32 %v1283_v13  ;;  %v1253_v24 = vmul.f32 -1.442695, %v2043_v20  ;;  %v1285_v25 = vmul.f32 -1.442695, %v2046_v21  ;;  %v1390_v26 = vpop.f32.mrb[4].mxu0  ;;  %v1438_v27 = vpop.f32.mrb[4].mxu1 }
  0xe1   :  { %1488 = vpow2.f32 %v1254_v22  ;;  %v2053_v28 = vadd.f32 %v1390_v26, %v2018_v1  ;;  %v2056_v29 = vadd.f32 %v1438_v27, %v2018_v1  ;;  %v369_v30 = vpop.f32.mrb[5].mxu0  ;;  %v529_v31 = vpop.f32.mrb[5].mxu1 }
  0xe2   :  { %1490 = vpow2.f32 %v1286_v23  ;;  %v2059_v32 = vadd.f32 %v2018_v1, %v369_v30  ;;  %v2062_v33 = vadd.f32 %v2018_v1, %v529_v31 }
  0xe3   :  { %1492 = vpow2.f32 %v1253_v24  ;;  %v1256_v34 = vmul.f32 -1.442695, %v2053_v28  ;;  %v1288_v35 = vmul.f32 -1.442695, %v2056_v29 }
  0xe4   :  { %1494 = vpow2.f32 %v1285_v25  ;;  %v1255_v36 = vmul.f32 -1.442695, %v2059_v32  ;;  %v1287_v37 = vmul.f32 -1.442695, %v2062_v33  ;;  %v1393_v38 = vpop.f32.mrb[6].mxu0  ;;  %v1441_v39 = vpop.f32.mrb[6].mxu1 }
  0xe5   :  { %1496 = vpow2.f32 %v1256_v34  ;;  %v2069_v40 = vadd.f32 %v1393_v38, %v2018_v1  ;;  %v379_v41 = vpop.f32.mrb[7].mxu0  ;;  %v539_v42 = vpop.f32.mrb[7].mxu1  ;;  %v2075_v10 = vadd.f32 %v1441_v39, %v2018_v1 }
  0xe6   :  { %1498 = vpow2.f32 %v1288_v35  ;;  %v2078_v13 = vadd.f32 %v2018_v1, %v379_v41  ;;  %v2083_v19 = vadd.f32 %v2018_v1, %v539_v42 }
  0xe7   :  { %v1481_v43 = vpop.eup %1480  ;;  %1500 = vpow2.f32 %v1255_v36  ;;  %v1258_v44 = vmul.f32 -1.442695, %v2069_v40  ;;  %v1290_v34 = vmul.f32 -1.442695, %v2075_v10 }
  0xe8   :  { %v1483_v45 = vpop.eup %1482  ;;  %v861_v46 = vadd.f32 1.0, %v1481_v43  ;;  %1502 = vpow2.f32 %v1287_v37  ;;  %v1396_v47 = vpop.f32.mrb[8].mxu0  ;;  %v1257_v38 = vmul.f32 -1.442695, %v2078_v13 }
  0xe9   :  { %v1485_v48 = vpop.eup %1484  ;;  %v893_v49 = vadd.f32 1.0, %v1483_v45  ;;  %1504 = vpow2.f32 %v1258_v44  ;;  %v1444_v50 = vpop.f32.mrb[8].mxu1  ;;  %v2090_v26 = vadd.f32 %v1396_v47, %v2018_v1  ;;  %v1289_v44 = vmul.f32 -1.442695, %v2083_v19 }
  0xea   :  { %v389_v51 = vpop.f32.mrb[9].mxu0  ;;  %v1487_v52 = vpop.eup %1486  ;;  %1506 = vrcp.f32 %v861_v46  ;;  %v860_v53 = vadd.f32 1.0, %v1485_v48  ;;  %v2096_v35 = vadd.f32 %v1444_v50, %v2018_v1 }
  0xeb   :  { %v549_v54 = vpop.f32.mrb[9].mxu1  ;;  %v1489_v55 = vpop.eup %1488  ;;  %1508 = vrcp.f32 %v893_v49  ;;  %v892_v56 = vadd.f32 1.0, %v1487_v52  ;;  %v2100_v39 = vadd.f32 %v2018_v1, %v389_v51  ;;  %v1260_v50 = vmul.f32 -1.442695, %v2090_v26 }
  0xec   :  { %v1491_v57 = vpop.eup %1490  ;;  %1510 = vrcp.f32 %v860_v53  ;;  %v863_v58 = vadd.f32 1.0, %v1489_v55  ;;  %v1399_v59 = vpop.f32.mrb[10].mxu0  ;;  %v2107_v45 = vadd.f32 %v2018_v1, %v549_v54  ;;  %v1292_v54 = vmul.f32 -1.442695, %v2096_v35 }
  0xed   :  { %v1493_v60 = vpop.eup %1492  ;;  %1512 = vrcp.f32 %v892_v56  ;;  %v895_v61 = vadd.f32 1.0, %v1491_v57  ;;  %v1447_v62 = vpop.f32.mrb[10].mxu1  ;;  %v2116_v51 = vadd.f32 %v1399_v59, %v2018_v1  ;;  %v1259_v57 = vmul.f32 -1.442695, %v2100_v39 }
  0xee   :  { %v399_v63 = vpop.f32.mrb[11].mxu0  ;;  %v1495_v0 = vpop.eup %1494  ;;  %1514 = vrcp.f32 %v863_v58  ;;  %v862_v2 = vadd.f32 1.0, %v1493_v60 }
  0xef   :  { %v2072_v3 = vpop.f32.mrb[11].mxu1  ;;  %v1497_v6 = vpop.eup %1496  ;;  %1516 = vrcp.f32 %v895_v61  ;;  %v894_v7 = vadd.f32 1.0, %v1495_v0  ;;  %v2136_v58 = vadd.f32 %v2018_v1, %v399_v63 }
  0xf0   :  { %v1499_v11 = vpop.eup %1498  ;;  %1518 = vrcp.f32 %v862_v2  ;;  %v865_v12 = vadd.f32 1.0, %v1497_v6  ;;  %v2080_v14 = vpop.f32.mrb[12].mxu0 }
  0xf1   :  { %v1501_v15 = vpop.eup %1500  ;;  %1520 = vrcp.f32 %v894_v7  ;;  %v897_v18 = vadd.f32 1.0, %v1499_v11  ;;  %v2085_v22 = vpop.f32.mrb[12].mxu1  ;;  %v2164_v7 = vadd.f32 %v2080_v14, %v2018_v1 }
  0xf2   :  { %v2087_v23 = vpop.f32.mrb[13].mxu0  ;;  %v1503_v24 = vpop.eup %1502  ;;  %1522 = vrcp.f32 %v865_v12  ;;  %v864_v25 = vadd.f32 1.0, %v1501_v15 }
  0xf3   :  { %v2092_v27 = vpop.f32.mrb[13].mxu1  ;;  %v1505_v30 = vpop.eup %1504  ;;  %1524 = vrcp.f32 %v897_v18  ;;  %v896_v31 = vadd.f32 1.0, %v1503_v24  ;;  %v1261_v18 = vmul.f32 -1.442695, %v2136_v58 }
  0xf4   :  { %v1507_v36 = vpop.eup %1506  ;;  %1526 = vrcp.f32 %v864_v25  ;;  %v867_v37 = vadd.f32 1.0, %v1505_v30  ;;  %v2102_v41 = vpop.f32.mrb[14].mxu0 }
  0xf5   :  { %v1509_v42 = vpop.eup %1508  ;;  %v1053_v43 = vmul.f32 %v1507_v36, %v2021_v4  ;;  %1528 = vrcp.f32 %v896_v31  ;;  %v2109_v46 = vpop.f32.mrb[14].mxu1 }
  0xf6   :  { %v2111_v47 = vpop.f32.mrb[15].mxu0  ;;  %v1511_v48 = vpop.eup %1510  ;;  %v1085_v49 = vmul.f32 %v1509_v42, %v2024_v5  ;;  %1530 = vrcp.f32 %v867_v37  ;;  %v2127_v5 = vadd.f32 %v1447_v62, %v2018_v1  ;;  %v2150_v62 = vadd.f32 %v2018_v1, %v2072_v3 }
  0xf7   :  { %v2118_v4 = vpop.f32.mrb[15].mxu1  ;;  %v1513_v52 = vpop.eup %1512  ;;  %1118 = vst.msk [vmem:[%s2662_s3 + $0x8] sm:$0xff] %vm1116_vm2, %v1053_v43  ;;  %v1052_v53 = vmul.f32 %v1511_v48, %v2027_v8  ;;  %1532 = vpow2.f32 %v1290_v34 }
  0xf8   :  { %v1515_v55 = vpop.eup %1514  ;;  %1150 = vst.msk [vmem:[%s2662_s3 + $0x108] sm:$0xff] %vm1116_vm2, %v1085_v49  ;;  %v1084_v56 = vmul.f32 %v1513_v52, %v2030_v9  ;;  %1534 = vpow2.f32 %v1257_v38  ;;  %v2138_v8 = vpop.f32.mrb[16].mxu0  ;;  %v1291_v9 = vmul.f32 -1.442695, %v2107_v45  ;;  %v1294_v12 = vmul.f32 -1.442695, %v2127_v5 }
  0xf9   :  { %v2140_v59 = vpop.f32.mrb[16].mxu1  ;;  %v1517_v60 = vpop.eup %1516  ;;  %1117 = vst.msk [vmem:[%s2662_s3] sm:$0xff] %vm1116_vm2, %v1052_v53  ;;  %v1055_v61 = vmul.f32 %v1515_v55, %v2037_v16  ;;  %1536 = vpow2.f32 %v1289_v44  ;;  %v1262_v16 = vmul.f32 -1.442695, %v2116_v51  ;;  %v1293_v30 = vmul.f32 -1.442695, %v2150_v62 }
  0xfa   :  { %v2152_v63 = vpop.f32.mrb[17].mxu0  ;;  %v2154_v0 = vpop.f32.mrb[17].mxu1  ;;  %1149 = vst.msk [vmem:[%s2662_s3 + $0x100] sm:$0xff] %vm1116_vm2, %v1084_v56  ;;  %v1087_v6 = vmul.f32 %v1517_v60, %v2040_v17  ;;  %1538 = vpow2.f32 %v1260_v50  ;;  %v2174_v17 = vadd.f32 %v2085_v22, %v2018_v1  ;;  %v2221_v49 = vadd.f32 %v2018_v1, %v2092_v27 }
  0xfb   :  { %v1519_v2 = vpop.eup %1518  ;;  %1120 = vst.msk [vmem:[%s2662_s3 + $0x18] sm:$0xff] %vm1116_vm2, %v1055_v61  ;;  %1540 = vpow2.f32 %v1292_v54 }
  0xfc   :  { %v1521_v3 = vpop.eup %1520  ;;  %v1054_v11 = vmul.f32 %v1519_v2, %v2043_v20  ;;  %1152 = vst.msk [vmem:[%s2662_s3 + $0x118] sm:$0xff] %vm1116_vm2, %v1087_v6  ;;  %1542 = vpow2.f32 %v1259_v57  ;;  %v2182_v24 = vpop.f32.mrb[18].mxu0  ;;  %v1296_v43 = vmul.f32 -1.442695, %v2174_v17 }
  0xfd   :  { %v1523_v15 = vpop.eup %1522  ;;  %v1086_v14 = vmul.f32 %v1521_v3, %v2046_v21  ;;  %v2184_v20 = vpop.f32.mrb[18].mxu1  ;;  %1544 = vpow2.f32 %v1291_v9  ;;  %v2194_v21 = vadd.f32 %v2018_v1, %v2087_v23  ;;  %v2252_v3 = vmul.f32 -1.442695, %v2221_v49 }
  0xfe   :  { %v1525_v25 = vpop.eup %1524  ;;  %1119 = vst.msk [vmem:[%s2662_s3 + $0x10] sm:$0xff] %vm1116_vm2, %v1054_v11  ;;  %v1057_v22 = vmul.f32 %v1523_v15, %v2053_v28  ;;  %v439_v31 = vpop.f32.mrb[19].mxu0  ;;  %1546 = vpow2.f32 %v1262_v16  ;;  %v1264_v28 = vmul.f32 -1.442695, %v2164_v7  ;;  %v2256_v11 = vadd.f32 %v2102_v41, %v2018_v1 }
  0xff   :  { %v599_v34 = vpop.f32.mrb[19].mxu1  ;;  %v1527_v36 = vpop.eup %1526  ;;  %1151 = vst.msk [vmem:[%s2662_s3 + $0x110] sm:$0xff] %vm1116_vm2, %v1086_v14  ;;  %v1089_v37 = vmul.f32 %v1525_v25, %v2056_v29  ;;  %v2203_v38 = vadd.f32 %v2018_v1, %v439_v31  ;;  %1548 = vpow2.f32 %v1294_v12  ;;  %v2246_v9 = vmul.f32 -1.442695, %v2194_v21 }
 0x100   :  { %v1529_v42 = vpop.eup %1528  ;;  %1122 = vst.msk [vmem:[%s2662_s3 + $0x28] sm:$0xff] %vm1116_vm2, %v1057_v22  ;;  %v1056_v23 = vmul.f32 %v1527_v36, %v2059_v32  ;;  %v2212_v44 = vadd.f32 %v2018_v1, %v599_v34  ;;  %1550 = vpow2.f32 %v1261_v18  ;;  %v1414_v32 = vpop.f32.mrb[20].mxu0  ;;  %v2260_v18 = vadd.f32 %v2109_v46, %v2018_v1 }
 0x101   :  { %v1531_v29 = vpop.eup %1530  ;;  %1154 = vst.msk [vmem:[%s2662_s3 + $0x128] sm:$0xff] %vm1116_vm2, %v1089_v37  ;;  %v1088_v48 = vmul.f32 %v1529_v42, %v2062_v33  ;;  %v1462_v50 = vpop.f32.mrb[20].mxu1  ;;  %1552 = vpow2.f32 %v1293_v30  ;;  %v2229_v54 = vadd.f32 %v1414_v32, %v2018_v1  ;;  %v2273_v46 = vadd.f32 %v2018_v1, %v2111_v47 }
 0x102   :  { %v1533_v52 = vpop.eup %1532  ;;  %1121 = vst.msk [vmem:[%s2662_s3 + $0x20] sm:$0xff] %vm1116_vm2, %v1056_v23  ;;  %v1059_v53 = vmul.f32 %v1531_v29, %v2069_v40  ;;  %v449_v33 = vpop.f32.mrb[21].mxu0  ;;  %1554 = vpow2.f32 %v1264_v28  ;;  %v2236_v57 = vadd.f32 %v1462_v50, %v2018_v1  ;;  %v2283_v32 = vadd.f32 %v2018_v1, %v2118_v4 }
 0x103   :  { %v609_v55 = vpop.f32.mrb[21].mxu1  ;;  %v1535_v56 = vpop.eup %1534  ;;  %1153 = vst.msk [vmem:[%s2662_s3 + $0x120] sm:$0xff] %vm1116_vm2, %v1088_v48  ;;  %v899_v27 = vadd.f32 1.0, %v1533_v52  ;;  %v2239_v60 = vadd.f32 %v2018_v1, %v449_v33  ;;  %1556 = vpow2.f32 %v1296_v43  ;;  %v2279_v48 = vmul.f32 -1.442695, %v2256_v11 }
 0x104   :  { %v1537_v40 = vpop.eup %1536  ;;  %1124 = vst.msk [vmem:[%s2662_s3 + $0x38] sm:$0xff] %vm1116_vm2, %v1059_v53  ;;  %v866_v61 = vadd.f32 1.0, %v1535_v56  ;;  %v2249_v2 = vadd.f32 %v2018_v1, %v609_v55  ;;  %v1417_v12 = vpop.f32.mrb[22].mxu0  ;;  %v2286_v47 = vmul.f32 -1.442695, %v2260_v18 }
 0x105   :  { %v1539_v6 = vpop.eup %1538  ;;  %1558 = vrcp.f32 %v899_v27  ;;  %v898_v16 = vadd.f32 1.0, %v1537_v40  ;;  %v2263_v25 = vadd.f32 %v1417_v12, %v2018_v1  ;;  %v1465_v22 = vpop.f32.mrb[22].mxu1 }
 0x106   :  { %v1541_v15 = vpop.eup %1540  ;;  %1560 = vrcp.f32 %v866_v61  ;;  %v869_v14 = vadd.f32 1.0, %v1539_v6  ;;  %v459_v30 = vpop.f32.mrb[23].mxu0  ;;  %v2266_v36 = vadd.f32 %v1465_v22, %v2018_v1 }
 0x107   :  { %v1543_v31 = vpop.eup %1542  ;;  %1562 = vrcp.f32 %v898_v16  ;;  %v901_v34 = vadd.f32 1.0, %v1541_v15  ;;  %v2269_v41 = vadd.f32 %v2018_v1, %v459_v30  ;;  %v619_v37 = vpop.f32.mrb[23].mxu1  ;;  %v2298_v15 = vmul.f32 -1.442695, %v2273_v46 }
 0x108   :  { %v1545_v28 = vpop.eup %1544  ;;  %1564 = vrcp.f32 %v869_v14  ;;  %v868_v42 = vadd.f32 1.0, %v1543_v31  ;;  %v2276_v23 = vadd.f32 %v2018_v1, %v619_v37  ;;  %v1420_v50 = vpop.f32.mrb[24].mxu0  ;;  %v2304_v31 = vmul.f32 -1.442695, %v2283_v32 }
 0x109   :  { %v1547_v43 = vpop.eup %1546  ;;  %1566 = vrcp.f32 %v901_v34  ;;  %v900_v29 = vadd.f32 1.0, %v1545_v28  ;;  %v2289_v33 = vadd.f32 %v1420_v50, %v2018_v1  ;;  %v1468_v55 = vpop.f32.mrb[24].mxu1  ;;  %v2308_v34 = vadd.f32 %v2138_v8, %v2018_v1 }
 0x10a   :  { %v1549_v52 = vpop.eup %1548  ;;  %1568 = vrcp.f32 %v868_v42  ;;  %v871_v53 = vadd.f32 1.0, %v1547_v43  ;;  %v469_v56 = vpop.f32.mrb[25].mxu0  ;;  %v2292_v61 = vadd.f32 %v1468_v55, %v2018_v1  ;;  %v2312_v43 = vadd.f32 %v2140_v59, %v2018_v1 }
 0x10b   :  { %v1551_v27 = vpop.eup %1550  ;;  %1570 = vrcp.f32 %v900_v29  ;;  %v903_v40 = vadd.f32 1.0, %v1549_v52  ;;  %v2295_v4 = vadd.f32 %v2018_v1, %v469_v56  ;;  %v629_v6 = vpop.f32.mrb[25].mxu1  ;;  %v2326_v59 = vadd.f32 %v2018_v1, %v2152_v63 }
 0x10c   :  { %v1553_v16 = vpop.eup %1552  ;;  %1572 = vrcp.f32 %v871_v53  ;;  %v870_v12 = vadd.f32 1.0, %v1551_v27  ;;  %v2301_v14 = vadd.f32 %v2018_v1, %v629_v6  ;;  %v1423_v37 = vpop.f32.mrb[26].mxu0 }
 0x10d   :  { %v1555_v22 = vpop.eup %1554  ;;  %1574 = vrcp.f32 %v903_v40  ;;  %v902_v30 = vadd.f32 1.0, %v1553_v16  ;;  %v2315_v29 = vadd.f32 %v1423_v37, %v2018_v1  ;;  %v1471_v50 = vpop.f32.mrb[26].mxu1  ;;  %v2335_v37 = vadd.f32 %v2018_v1, %v2154_v0 }
 0x10e   :  { %v1557_v28 = vpop.eup %1556  ;;  %1576 = vrcp.f32 %v870_v12  ;;  %v873_v42 = vadd.f32 1.0, %v1555_v22  ;;  %v479_v52 = vpop.f32.mrb[27].mxu0  ;;  %v2318_v56 = vadd.f32 %v1471_v50, %v2018_v1 }
 0x10f   :  { %v1559_v53 = vpop.eup %1558  ;;  %1578 = vrcp.f32 %v902_v30  ;;  %v905_v55 = vadd.f32 1.0, %v1557_v28  ;;  %v2321_v8 = vadd.f32 %v2018_v1, %v479_v52  ;;  %v639_v27 = vpop.f32.mrb[27].mxu1  ;;  %v1268_v30 = vmul.f32 -1.442695, %v2308_v34 }
 0x110   :  { %v1561_v40 = vpop.eup %1560  ;;  %v1091_v6 = vmul.f32 %v1559_v53, %v2075_v10  ;;  %1580 = vrcp.f32 %v873_v42  ;;  %v2329_v16 = vadd.f32 %v2018_v1, %v639_v27  ;;  %v1426_v28 = vpop.f32.mrb[28].mxu0 }
 0x111   :  { %v1563_v12 = vpop.eup %1562  ;;  %v1058_v22 = vmul.f32 %v1561_v40, %v2078_v13  ;;  %1582 = vrcp.f32 %v905_v55  ;;  %v1474_v10 = vpop.f32.mrb[28].mxu1  ;;  %v1300_v13 = vmul.f32 -1.442695, %v2312_v43  ;;  %v2345_v50 = vadd.f32 %v1426_v28, %v2018_v1 }
 0x112   :  { %v1565_v42 = vpop.eup %1564  ;;  %1156 = vst.msk [vmem:[%s2662_s3 + $0x138] sm:$0xff] %vm1116_vm2, %v1091_v6  ;;  %v1090_v63 = vmul.f32 %v1563_v12, %v2083_v19  ;;  %1584 = vpow2.f32 %v2246_v9  ;;  %v489_v52 = vpop.f32.mrb[29].mxu0  ;;  %v2354_v19 = vadd.f32 %v1474_v10, %v2018_v1 }
 0x113   :  { %v649_v0 = vpop.f32.mrb[29].mxu1  ;;  %v1567_v53 = vpop.eup %1566  ;;  %1123 = vst.msk [vmem:[%s2662_s3 + $0x30] sm:$0xff] %vm1116_vm2, %v1058_v22  ;;  %v1061_v55 = vmul.f32 %v1565_v42, %v2090_v26  ;;  %1586 = vpow2.f32 %v2252_v3  ;;  %v2357_v9 = vadd.f32 %v2018_v1, %v489_v52  ;;  %v2367_v26 = vadd.f32 %v2182_v24, %v2018_v1 }
 0x114   :  { %v1569_v27 = vpop.eup %1568  ;;  %1155 = vst.msk [vmem:[%s2662_s3 + $0x130] sm:$0xff] %vm1116_vm2, %v1090_v63  ;;  %v1093_v40 = vmul.f32 %v1567_v53, %v2096_v35  ;;  %1588 = vpow2.f32 %v2279_v48  ;;  %v2370_v3 = vadd.f32 %v2018_v1, %v649_v0  ;;  %v1267_v35 = vmul.f32 -1.442695, %v2326_v59  ;;  %v1429_v24 = vpop.f32.mrb[30].mxu0 }
 0x115   :  { %v1571_v6 = vpop.eup %1570  ;;  %1126 = vst.msk [vmem:[%s2662_s3 + $0x48] sm:$0xff] %vm1116_vm2, %v1061_v55  ;;  %v1060_v12 = vmul.f32 %v1569_v27, %v2100_v39  ;;  %1590 = vpow2.f32 %v2286_v47  ;;  %v2381_v48 = vadd.f32 %v2184_v20, %v2018_v1  ;;  %v1477_v22 = vpop.f32.mrb[30].mxu1  ;;  %v1299_v39 = vmul.f32 -1.442695, %v2335_v37 }
 0x116   :  { %v1573_v28 = vpop.eup %1572  ;;  %1158 = vst.msk [vmem:[%s2662_s3 + $0x148] sm:$0xff] %vm1116_vm2, %v1093_v40  ;;  %v1092_v10 = vmul.f32 %v1571_v6, %v2107_v45  ;;  %1592 = vpow2.f32 %v2298_v15  ;;  %v2391_v47 = vadd.f32 %v1429_v24, %v2018_v1  ;;  %v499_v42 = vpop.f32.mrb[31].mxu0  ;;  %v2400_v45 = vadd.f32 %v1477_v22, %v2018_v1 }
 0x117   :  { %v659_v20 = vpop.f32.mrb[31].mxu1  ;;  %v1575_v63 = vpop.eup %1574  ;;  %1125 = vst.msk [vmem:[%s2662_s3 + $0x40] sm:$0xff] %vm1116_vm2, %v1060_v12  ;;  %v1063_v52 = vmul.f32 %v1573_v28, %v2116_v51  ;;  %1594 = vpow2.f32 %v2304_v31  ;;  %v2403_v15 = vadd.f32 %v2018_v1, %v499_v42  ;;  %v1270_v55 = vmul.f32 -1.442695, %v2367_v26 }
 0x118   :  { %v1577_v0 = vpop.eup %1576  ;;  %1157 = vst.msk [vmem:[%s2662_s3 + $0x140] sm:$0xff] %vm1116_vm2, %v1092_v10  ;;  %v1095_v53 = vmul.f32 %v1575_v63, %v2127_v5  ;;  %1596 = vpow2.f32 %v1268_v30  ;;  %v2412_v51 = vadd.f32 %v2018_v1, %v659_v20  ;;  %v1302_v40 = vmul.f32 -1.442695, %v2381_v48 }
 0x119   :  { %v1579_v31 = vpop.eup %1578  ;;  %1128 = vst.msk [vmem:[%s2662_s3 + $0x58] sm:$0xff] %vm1116_vm2, %v1063_v52  ;;  %v1062_v27 = vmul.f32 %v1577_v0, %v2136_v58  ;;  %1598 = vpow2.f32 %v1300_v13  ;;  %v1269_v5 = vmul.f32 -1.442695, %v2203_v38 }
 0x11a   :  { %v1581_v6 = vpop.eup %1580  ;;  %1160 = vst.msk [vmem:[%s2662_s3 + $0x158] sm:$0xff] %vm1116_vm2, %v1095_v53  ;;  %v1094_v1 = vmul.f32 %v1579_v31, %v2150_v62  ;;  %1600 = vpow2.f32 %v1267_v35 }
 0x11b   :  { %v1583_v30 = vpop.eup %1582  ;;  %1127 = vst.msk [vmem:[%s2662_s3 + $0x50] sm:$0xff] %vm1116_vm2, %v1062_v27  ;;  %v1065_v58 = vmul.f32 %v1581_v6, %v2164_v7  ;;  %1602 = vpow2.f32 %v1299_v39 }
 0x11c   :  { %v1585_v13 = vpop.eup %1584  ;;  %1159 = vst.msk [vmem:[%s2662_s3 + $0x150] sm:$0xff] %vm1116_vm2, %v1094_v1  ;;  %v1097_v62 = vmul.f32 %v1583_v30, %v2174_v17  ;;  %1604 = vpow2.f32 %v1270_v55 }
 0x11d   :  { %v1587_v12 = vpop.eup %1586  ;;  %1130 = vst.msk [vmem:[%s2662_s3 + $0x68] sm:$0xff] %vm1116_vm2, %v1065_v58  ;;  %v872_v35 = vadd.f32 1.0, %v1585_v13  ;;  %1606 = vpow2.f32 %v1302_v40  ;;  %v1301_v13 = vmul.f32 -1.442695, %v2212_v44 }
 0x11e   :  { %v1589_v24 = vpop.eup %1588  ;;  %1162 = vst.msk [vmem:[%s2662_s3 + $0x168] sm:$0xff] %vm1116_vm2, %v1097_v62  ;;  %v904_v7 = vadd.f32 1.0, %v1587_v12  ;;  %1608 = vpow2.f32 %v1269_v5 }
 0x11f   :  { %v1591_v22 = vpop.eup %1590  ;;  %1610 = vrcp.f32 %v872_v35  ;;  %v875_v17 = vadd.f32 1.0, %v1589_v24  ;;  %v1272_v35 = vmul.f32 -1.442695, %v2229_v54 }
 0x120   :  { %v1593_v28 = vpop.eup %1592  ;;  %1612 = vrcp.f32 %v904_v7  ;;  %v907_v10 = vadd.f32 1.0, %v1591_v22  ;;  %v1304_v22 = vmul.f32 -1.442695, %v2236_v57 }
 0x121   :  { %v1595_v39 = vpop.eup %1594  ;;  %1614 = vrcp.f32 %v875_v17  ;;  %v874_v42 = vadd.f32 1.0, %v1593_v28 }
 0x122   :  { %v1597_v20 = vpop.eup %1596  ;;  %1616 = vrcp.f32 %v907_v10  ;;  %v906_v63 = vadd.f32 1.0, %v1595_v39  ;;  %v1271_v10 = vmul.f32 -1.442695, %v2239_v60 }
 0x123   :  { %v1599_v52 = vpop.eup %1598  ;;  %1618 = vrcp.f32 %v874_v42  ;;  %v877_v0 = vadd.f32 1.0, %v1597_v20 }
 0x124   :  { %v1601_v53 = vpop.eup %1600  ;;  %1620 = vrcp.f32 %v906_v63  ;;  %v909_v55 = vadd.f32 1.0, %v1599_v52  ;;  %v1274_v63 = vmul.f32 -1.442695, %v2263_v25 }
 0x125   :  { %v1603_v31 = vpop.eup %1602  ;;  %1622 = vrcp.f32 %v877_v0  ;;  %v876_v27 = vadd.f32 1.0, %v1601_v53  ;;  %v1306_v0 = vmul.f32 -1.442695, %v2266_v36 }
 0x126   :  { %v1605_v40 = vpop.eup %1604  ;;  %1624 = vrcp.f32 %v909_v55  ;;  %v908_v6 = vadd.f32 1.0, %v1603_v31  ;;  %v1273_v55 = vmul.f32 -1.442695, %v2269_v41 }
 0x127   :  { %v1607_v1 = vpop.eup %1606  ;;  %1626 = vrcp.f32 %v876_v27  ;;  %v879_v5 = vadd.f32 1.0, %v1605_v40  ;;  %v1305_v27 = vmul.f32 -1.442695, %v2276_v23 }
 0x128   :  { %v1609_v30 = vpop.eup %1608  ;;  %1628 = vrcp.f32 %v908_v6  ;;  %v911_v58 = vadd.f32 1.0, %v1607_v1  ;;  %v1276_v6 = vmul.f32 -1.442695, %v2289_v33 }
 0x129   :  { %v1611_v62 = vpop.eup %1610  ;;  %1630 = vrcp.f32 %v879_v5  ;;  %v878_v12 = vadd.f32 1.0, %v1609_v30  ;;  %v1308_v5 = vmul.f32 -1.442695, %v2292_v61 }
 0x12a   :  { %v1613_v24 = vpop.eup %1612  ;;  %v1064_v7 = vmul.f32 %v1611_v62, %v2194_v21  ;;  %1632 = vrcp.f32 %v911_v58  ;;  %v1303_v21 = vmul.f32 -1.442695, %v2249_v2  ;;  %v1275_v58 = vmul.f32 -1.442695, %v2295_v4 }
 0x12b   :  { %v1615_v17 = vpop.eup %1614  ;;  %v1096_v28 = vmul.f32 %v1613_v24, %v2221_v49  ;;  %1634 = vrcp.f32 %v878_v12  ;;  %v1307_v62 = vmul.f32 -1.442695, %v2301_v14 }
 0x12c   :  { %v1617_v39 = vpop.eup %1616  ;;  %1129 = vst.msk [vmem:[%s2662_s3 + $0x60] sm:$0xff] %vm1116_vm2, %v1064_v7  ;;  %v1067_v42 = vmul.f32 %v1615_v17, %v2256_v11  ;;  %1636 = vpow2.f32 %v1301_v13 }
 0x12d   :  { %v1619_v20 = vpop.eup %1618  ;;  %1161 = vst.msk [vmem:[%s2662_s3 + $0x160] sm:$0xff] %vm1116_vm2, %v1096_v28  ;;  %v1099_v49 = vmul.f32 %v1617_v39, %v2260_v18  ;;  %1638 = vpow2.f32 %v1272_v35 }
 0x12e   :  { %v1621_v52 = vpop.eup %1620  ;;  %1132 = vst.msk [vmem:[%s2662_s3 + $0x78] sm:$0xff] %vm1116_vm2, %v1067_v42  ;;  %v1066_v11 = vmul.f32 %v1619_v20, %v2273_v46  ;;  %1640 = vpow2.f32 %v1304_v22 }
 0x12f   :  { %v1623_v53 = vpop.eup %1622  ;;  %1164 = vst.msk [vmem:[%s2662_s3 + $0x178] sm:$0xff] %vm1116_vm2, %v1099_v49  ;;  %v1098_v18 = vmul.f32 %v1621_v52, %v2283_v32  ;;  %1642 = vpow2.f32 %v1271_v10 }
 0x130   :  { %v1625_v31 = vpop.eup %1624  ;;  %1131 = vst.msk [vmem:[%s2662_s3 + $0x70] sm:$0xff] %vm1116_vm2, %v1066_v11  ;;  %v1069_v46 = vmul.f32 %v1623_v53, %v2308_v34  ;;  %1644 = vpow2.f32 %v1303_v21 }
 0x131   :  { %v1627_v40 = vpop.eup %1626  ;;  %1163 = vst.msk [vmem:[%s2662_s3 + $0x170] sm:$0xff] %vm1116_vm2, %v1098_v18  ;;  %v1101_v32 = vmul.f32 %v1625_v31, %v2312_v43  ;;  %1646 = vpow2.f32 %v1274_v63 }
 0x132   :  { %v1629_v1 = vpop.eup %1628  ;;  %1134 = vst.msk [vmem:[%s2662_s3 + $0x88] sm:$0xff] %vm1116_vm2, %v1069_v46  ;;  %v1068_v34 = vmul.f32 %v1627_v40, %v2326_v59  ;;  %1648 = vpow2.f32 %v1306_v0 }
 0x133   :  { %v1631_v30 = vpop.eup %1630  ;;  %1166 = vst.msk [vmem:[%s2662_s3 + $0x188] sm:$0xff] %vm1116_vm2, %v1101_v32  ;;  %v1100_v43 = vmul.f32 %v1629_v1, %v2335_v37  ;;  %1650 = vpow2.f32 %v1273_v55  ;;  %v1278_v32 = vmul.f32 -1.442695, %v2315_v29 }
 0x134   :  { %v1633_v13 = vpop.eup %1632  ;;  %1133 = vst.msk [vmem:[%s2662_s3 + $0x80] sm:$0xff] %vm1116_vm2, %v1068_v34  ;;  %v1071_v59 = vmul.f32 %v1631_v30, %v2367_v26  ;;  %1652 = vpow2.f32 %v1305_v27  ;;  %v1310_v34 = vmul.f32 -1.442695, %v2318_v56 }
 0x135   :  { %v1635_v12 = vpop.eup %1634  ;;  %1165 = vst.msk [vmem:[%s2662_s3 + $0x180] sm:$0xff] %vm1116_vm2, %v1100_v43  ;;  %v1103_v37 = vmul.f32 %v1633_v13, %v2381_v48  ;;  %1654 = vpow2.f32 %v1276_v6  ;;  %v1277_v43 = vmul.f32 -1.442695, %v2321_v8 }
 0x136   :  { %v1637_v35 = vpop.eup %1636  ;;  %1136 = vst.msk [vmem:[%s2662_s3 + $0x98] sm:$0xff] %vm1116_vm2, %v1071_v59  ;;  %v1070_v26 = vmul.f32 %v1635_v12, %v2203_v38  ;;  %1656 = vpow2.f32 %v1308_v5  ;;  %v1309_v59 = vmul.f32 -1.442695, %v2329_v16 }
 0x137   :  { %v1639_v24 = vpop.eup %1638  ;;  %1168 = vst.msk [vmem:[%s2662_s3 + $0x198] sm:$0xff] %vm1116_vm2, %v1103_v37  ;;  %v910_v7 = vadd.f32 1.0, %v1637_v35  ;;  %1658 = vpow2.f32 %v1275_v58  ;;  %v1312_v35 = vmul.f32 -1.442695, %v2354_v19 }
 0x138   :  { %v1641_v22 = vpop.eup %1640  ;;  %1135 = vst.msk [vmem:[%s2662_s3 + $0x90] sm:$0xff] %vm1116_vm2, %v1070_v26  ;;  %v881_v48 = vadd.f32 1.0, %v1639_v24  ;;  %1660 = vpow2.f32 %v1307_v62  ;;  %v1279_v24 = vmul.f32 -1.442695, %v2357_v9 }
 0x139   :  { %v1643_v17 = vpop.eup %1642  ;;  %1662 = vrcp.f32 %v910_v7  ;;  %v913_v38 = vadd.f32 1.0, %v1641_v22  ;;  %v1311_v22 = vmul.f32 -1.442695, %v2370_v3 }
 0x13a   :  { %v1645_v28 = vpop.eup %1644  ;;  %1664 = vrcp.f32 %v881_v48  ;;  %v880_v10 = vadd.f32 1.0, %v1643_v17  ;;  %v1282_v17 = vmul.f32 -1.442695, %v2391_v47 }
 0x13b   :  { %v1647_v39 = vpop.eup %1646  ;;  %1666 = vrcp.f32 %v913_v38  ;;  %v912_v42 = vadd.f32 1.0, %v1645_v28  ;;  %v1314_v28 = vmul.f32 -1.442695, %v2400_v45 }
 0x13c   :  { %v1649_v21 = vpop.eup %1648  ;;  %1668 = vrcp.f32 %v880_v10  ;;  %v883_v20 = vadd.f32 1.0, %v1647_v39  ;;  %v1281_v39 = vmul.f32 -1.442695, %v2403_v15 }
 0x13d   :  { %v1651_v49 = vpop.eup %1650  ;;  %1670 = vrcp.f32 %v912_v42  ;;  %v915_v63 = vadd.f32 1.0, %v1649_v21  ;;  %v1313_v21 = vmul.f32 -1.442695, %v2412_v51 }
 0x13e   :  { %v1653_v52 = vpop.eup %1652  ;;  %1672 = vrcp.f32 %v883_v20  ;;  %v882_v11 = vadd.f32 1.0, %v1651_v49 }
 0x13f   :  { %v1655_v0 = vpop.eup %1654  ;;  %1674 = vrcp.f32 %v915_v63  ;;  %v914_v53 = vadd.f32 1.0, %v1653_v52 }
 0x140   :  { %v1657_v18 = vpop.eup %1656  ;;  %1676 = vrcp.f32 %v882_v11  ;;  %v885_v55 = vadd.f32 1.0, %v1655_v0 }
 0x141   :  { %v1659_v31 = vpop.eup %1658  ;;  %1678 = vrcp.f32 %v914_v53  ;;  %v917_v46 = vadd.f32 1.0, %v1657_v18 }
 0x142   :  { %v1661_v27 = vpop.eup %1660  ;;  %1680 = vrcp.f32 %v885_v55  ;;  %v884_v40 = vadd.f32 1.0, %v1659_v31 }
 0x143   :  { %v1663_v6 = vpop.eup %1662  ;;  %1682 = vrcp.f32 %v917_v46  ;;  %v916_v1 = vadd.f32 1.0, %v1661_v27 }
 0x144   :  { %v1665_v5 = vpop.eup %1664  ;;  %v1102_v30 = vmul.f32 %v1663_v6, %v2212_v44  ;;  %1684 = vrcp.f32 %v884_v40  ;;  %v1280_v44 = vmul.f32 -1.442695, %v2345_v50 }
 0x145   :  { %v1667_v58 = vpop.eup %1666  ;;  %v1073_v13 = vmul.f32 %v1665_v5, %v2229_v54  ;;  %1686 = vrcp.f32 %v916_v1 }
 0x146   :  { %v1669_v62 = vpop.eup %1668  ;;  %1167 = vst.msk [vmem:[%s2662_s3 + $0x190] sm:$0xff] %vm1116_vm2, %v1102_v30  ;;  %v1105_v12 = vmul.f32 %v1667_v58, %v2236_v57  ;;  %1688 = vpow2.f32 %v1278_v32 }
 0x147   :  { %v1671_v37 = vpop.eup %1670  ;;  %1138 = vst.msk [vmem:[%s2662_s3 + $0xa8] sm:$0xff] %vm1116_vm2, %v1073_v13  ;;  %v1072_v54 = vmul.f32 %v1669_v62, %v2239_v60  ;;  %1690 = vpow2.f32 %v1310_v34 }
 0x148   :  { %v1673_v26 = vpop.eup %1672  ;;  %1170 = vst.msk [vmem:[%s2662_s3 + $0x1a8] sm:$0xff] %vm1116_vm2, %v1105_v12  ;;  %v1104_v57 = vmul.f32 %v1671_v37, %v2249_v2  ;;  %1692 = vpow2.f32 %v1277_v43 }
 0x149   :  { %v1675_v7 = vpop.eup %1674  ;;  %1137 = vst.msk [vmem:[%s2662_s3 + $0xa0] sm:$0xff] %vm1116_vm2, %v1072_v54  ;;  %v1075_v60 = vmul.f32 %v1673_v26, %v2263_v25  ;;  %1694 = vpow2.f32 %v1309_v59 }
 0x14a   :  { %v1677_v48 = vpop.eup %1676  ;;  %1169 = vst.msk [vmem:[%s2662_s3 + $0x1a0] sm:$0xff] %vm1116_vm2, %v1104_v57  ;;  %v1107_v2 = vmul.f32 %v1675_v7, %v2266_v36  ;;  %1696 = vpow2.f32 %v1280_v44 }
 0x14b   :  { %v1679_v38 = vpop.eup %1678  ;;  %1140 = vst.msk [vmem:[%s2662_s3 + $0xb8] sm:$0xff] %vm1116_vm2, %v1075_v60  ;;  %v1074_v25 = vmul.f32 %v1677_v48, %v2269_v41  ;;  %1698 = vpow2.f32 %v1312_v35 }
 0x14c   :  { %v1681_v10 = vpop.eup %1680  ;;  %1172 = vst.msk [vmem:[%s2662_s3 + $0x1b8] sm:$0xff] %vm1116_vm2, %v1107_v2  ;;  %v1106_v36 = vmul.f32 %v1679_v38, %v2276_v23  ;;  %1700 = vpow2.f32 %v1279_v24 }
 0x14d   :  { %v1683_v42 = vpop.eup %1682  ;;  %1139 = vst.msk [vmem:[%s2662_s3 + $0xb0] sm:$0xff] %vm1116_vm2, %v1074_v25  ;;  %v1077_v41 = vmul.f32 %v1681_v10, %v2289_v33  ;;  %1702 = vpow2.f32 %v1311_v22 }
 0x14e   :  { %v1685_v20 = vpop.eup %1684  ;;  %1171 = vst.msk [vmem:[%s2662_s3 + $0x1b0] sm:$0xff] %vm1116_vm2, %v1106_v36  ;;  %v1109_v23 = vmul.f32 %v1683_v42, %v2292_v61  ;;  %1704 = vpow2.f32 %v1282_v17 }
 0x14f   :  { %v1687_v49 = vpop.eup %1686  ;;  %1142 = vst.msk [vmem:[%s2662_s3 + $0xc8] sm:$0xff] %vm1116_vm2, %v1077_v41  ;;  %v1076_v33 = vmul.f32 %v1685_v20, %v2295_v4  ;;  %1706 = vpow2.f32 %v1314_v28 }
 0x150   :  { %v1689_v63 = vpop.eup %1688  ;;  %1174 = vst.msk [vmem:[%s2662_s3 + $0x1c8] sm:$0xff] %vm1116_vm2, %v1109_v23  ;;  %v1108_v52 = vmul.f32 %v1687_v49, %v2301_v14  ;;  %1708 = vpow2.f32 %v1281_v39 }
 0x151   :  { %v1691_v61 = vpop.eup %1690  ;;  %1141 = vst.msk [vmem:[%s2662_s3 + $0xc0] sm:$0xff] %vm1116_vm2, %v1076_v33  ;;  %v887_v11 = vadd.f32 1.0, %v1689_v63  ;;  %1710 = vpow2.f32 %v1313_v21 }
 0x152   :  { %v1693_v0 = vpop.eup %1692  ;;  %1173 = vst.msk [vmem:[%s2662_s3 + $0x1c0] sm:$0xff] %vm1116_vm2, %v1108_v52  ;;  %v919_v4 = vadd.f32 1.0, %v1691_v61 }
 0x153   :  { %v1695_v53 = vpop.eup %1694  ;;  %1712 = vrcp.f32 %v887_v11  ;;  %v886_v18 = vadd.f32 1.0, %v1693_v0 }
 0x154   :  { %v1697_v14 = vpop.eup %1696  ;;  %1714 = vrcp.f32 %v919_v4  ;;  %v918_v55 = vadd.f32 1.0, %v1695_v53 }
 0x155   :  { %v1699_v31 = vpop.eup %1698  ;;  %1716 = vrcp.f32 %v886_v18  ;;  %v889_v46 = vadd.f32 1.0, %v1697_v14 }
 0x156   :  { %v1701_v27 = vpop.eup %1700  ;;  %1718 = vrcp.f32 %v918_v55  ;;  %v921_v40 = vadd.f32 1.0, %v1699_v31 }
 0x157   :  { %v1703_v32 = vpop.eup %1702  ;;  %1720 = vrcp.f32 %v889_v46  ;;  %v888_v6 = vadd.f32 1.0, %v1701_v27 }
 0x158   :  { %v1705_v1 = vpop.eup %1704  ;;  %1722 = vrcp.f32 %v921_v40  ;;  %v920_v34 = vadd.f32 1.0, %v1703_v32 }
 0x159   :  { %v1707_v5 = vpop.eup %1706  ;;  %1724 = vrcp.f32 %v888_v6  ;;  %v891_v30 = vadd.f32 1.0, %v1705_v1 }
 0x15a   :  { %v1709_v43 = vpop.eup %1708  ;;  %1726 = vrcp.f32 %v920_v34  ;;  %v923_v58 = vadd.f32 1.0, %v1707_v5 }
 0x15b   :  { %v1711_v13 = vpop.eup %1710  ;;  %1728 = vrcp.f32 %v891_v30  ;;  %v890_v59 = vadd.f32 1.0, %v1709_v43 }
 0x15c   :  { %1730 = vrcp.f32 %v923_v58  ;;  %v922_v62 = vadd.f32 1.0, %v1711_v13 }
 0x15d   :  { %v1713_v12 = vpop.eup %1712  ;;  %1732 = vrcp.f32 %v890_v59 }
 0x15e   :  { %v1715_v44 = vpop.eup %1714  ;;  %v1079_v37 = vmul.f32 %v1713_v12, %v2315_v29  ;;  %1734 = vrcp.f32 %v922_v62 }
 0x15f   :  { %v1717_v54 = vpop.eup %1716  ;;  %v1111_v35 = vmul.f32 %v1715_v44, %v2318_v56 }
 0x160   :  { %v1719_v26 = vpop.eup %1718  ;;  %1144 = vst.msk [vmem:[%s2662_s3 + $0xd8] sm:$0xff] %vm1116_vm2, %v1079_v37  ;;  %v1078_v57 = vmul.f32 %v1717_v54, %v2321_v8 }
 0x161   :  { %v1721_v24 = vpop.eup %1720  ;;  %1176 = vst.msk [vmem:[%s2662_s3 + $0x1d8] sm:$0xff] %vm1116_vm2, %v1111_v35  ;;  %v1110_v29 = vmul.f32 %v1719_v26, %v2329_v16 }
 0x162   :  { %v1723_v7 = vpop.eup %1722  ;;  %1143 = vst.msk [vmem:[%s2662_s3 + $0xd0] sm:$0xff] %vm1116_vm2, %v1078_v57  ;;  %v1081_v56 = vmul.f32 %v1721_v24, %v2345_v50 }
 0x163   :  { %v1725_v60 = vpop.eup %1724  ;;  %1175 = vst.msk [vmem:[%s2662_s3 + $0x1d0] sm:$0xff] %vm1116_vm2, %v1110_v29  ;;  %v1113_v8 = vmul.f32 %v1723_v7, %v2354_v19 }
 0x164   :  { %v1727_v22 = vpop.eup %1726  ;;  %1146 = vst.msk [vmem:[%s2662_s3 + $0xe8] sm:$0xff] %vm1116_vm2, %v1081_v56  ;;  %v1080_v16 = vmul.f32 %v1725_v60, %v2357_v9 }
 0x165   :  { %v1729_v48 = vpop.eup %1728  ;;  %1178 = vst.msk [vmem:[%s2662_s3 + $0x1e8] sm:$0xff] %vm1116_vm2, %v1113_v8  ;;  %v1112_v50 = vmul.f32 %v1727_v22, %v2370_v3 }
 0x166   :  { %v1731_v2 = vpop.eup %1730  ;;  %1145 = vst.msk [vmem:[%s2662_s3 + $0xe0] sm:$0xff] %vm1116_vm2, %v1080_v16  ;;  %v1083_v19 = vmul.f32 %v1729_v48, %v2391_v47 }
 0x167   :  { %v1733_v17 = vpop.eup %1732  ;;  %1177 = vst.msk [vmem:[%s2662_s3 + $0x1e0] sm:$0xff] %vm1116_vm2, %v1112_v50  ;;  %v1115_v9 = vmul.f32 %v1731_v2, %v2400_v45 }
 0x168   :  { %v1735_v38 = vpop.eup %1734  ;;  %1148 = vst.msk [vmem:[%s2662_s3 + $0xf8] sm:$0xff] %vm1116_vm2, %v1083_v19  ;;  %v1082_v3 = vmul.f32 %v1733_v17, %v2403_v15 }
 0x169   :  { %1180 = vst.msk [vmem:[%s2662_s3 + $0x1f8] sm:$0xff] %vm1116_vm2, %v1115_v9  ;;  %v1114_v47 = vmul.f32 %v1735_v38, %v2412_v51 }
 0x16a   :  { %1147 = vst.msk [vmem:[%s2662_s3 + $0xf0] sm:$0xff] %vm1116_vm2, %v1082_v3 }
 0x16b   :  { %1179 = vst.msk [vmem:[%s2662_s3 + $0x1f0] sm:$0xff] %vm1116_vm2, %v1114_v47 }

</bundles_post_ra>
